<compile_context>
chip_gen: v7x
topology: tpu7x:2x2x1
jax: 0.10.0
libtpu: 0.0.40
codegen_flags: <defaults>
</compile_context>

<pallas_src>
import math
import functools

import jax
import jax.numpy as jnp
from jax import lax
from jax.experimental import pallas as pl
from jax.experimental.pallas import tpu as pltpu


def _linformer_mha_kernel(x_ref, eft_ref, wq_ref, wk_ref, wv_ref,
                          eb_ref, fb_ref, wo_ref, bo_ref, o_ref,
                          *, n_heads, dim, dim_k, activation, compute_dtype,
                          exact_softmax):
    """One grid step == one batch.  x_ref: (N, C); o_ref: (N, C)."""
    H, D, K = n_heads, dim, dim_k
    cdt = compute_dtype

    def mm(a, b):
        # Only the MXU operands are cast (bf16 by default); accumulate in f32.
        return jnp.dot(a.astype(cdt), b.astype(cdt),
                       preferred_element_type=jnp.float32)

    def mm_tb(a, b):
        # (N, D) x (K, D) -> (N, K): contract last dims of both (no Kp transpose needed).
        return lax.dot_general(a.astype(cdt), b.astype(cdt),
                               dimension_numbers=(((1,), (1,)), ((), ())),
                               preferred_element_type=jnp.float32)

    x_b = x_ref[...]                                     # (N, C)

    # One fused length-N contraction for ALL heads, both E and F paths:
    #   ef_x[h*K:(h+1)*K, :]        = E_h^T @ x_b   (K, C)
    #   ef_x[(H+h)*K:(H+h+1)*K, :]  = F_h^T @ x_b   (K, C)
    ef_x = mm(eft_ref[...], x_b)                         # (2*H*K, C)

    o_heads = []
    for h in range(H):                                   # static unroll, n_heads is small
        ex_h = ef_x[h * K:(h + 1) * K, :]                # sublane slice (multiple of K >= 8)
        fx_h = ef_x[(H + h) * K:(H + h + 1) * K, :]
        kpt = mm(ex_h, wk_ref[h]) + eb_ref[h]            # (K, D) = Kp_h^T, bias f32
        vpt = mm(fx_h, wv_ref[h]) + fb_ref[h]            # (K, D) = Vp_h^T, bias f32

        q_h = mm(x_b, wq_ref[h])                         # (N, D), 1/sqrt(dim) folded into Wq

        s = mm_tb(q_h, kpt)                              # (N, K) scores, f32
        s = s - jnp.max(s, axis=-1, keepdims=True)       # numerically-stable softmax
        p = jnp.exp(s)
        denom = jnp.sum(p, axis=-1, keepdims=True)
        if exact_softmax:
            p = p / denom
        else:
            p = p * pl.reciprocal(denom, approx=True)    # EUP slot, ~free
        # dropout(p) is identity here (dropout prob = 0.0 / eval mode)

        o_heads.append(mm(p, vpt))                       # (N, D), f32

    # Lane-concat heads and run ONE output projection with contraction depth H*D.
    o_cat = o_heads[0] if H == 1 else jnp.concatenate(o_heads, axis=-1)   # (N, H*D)
    if activation == "relu":
        o_cat = jnp.maximum(o_cat, 0.0)
    elif activation == "gelu":
        o_cat = jax.nn.gelu(o_cat, approximate=False)

    y = mm(o_cat, wo_ref[...])                           # (N, C)
    o_ref[...] = (y + bo_ref[...]).astype(o_ref.dtype)   # per-batch block store


def linformer_mha(x, params, *, dim, dim_k, n_heads, activation,
                  use_bf16=True, exact_softmax=False):
    """Forward pass of LinformerMultiHeadAttention.

    use_bf16      -> cast MXU operands to bfloat16 at the pallas_call boundary (good on
                     v5e/v6e/v7x: the MXU is bf16-native on all of them); accumulation,
                     softmax, activation and biases stay float32.
    exact_softmax -> use a true divide instead of pl.reciprocal(approx=True) for the
                     softmax normalisation (closer parity with the PyTorch reference).
    """
    B, N, C = x.shape
    H, D, K = n_heads, dim, dim_k
    out_dtype = x.dtype
    scale = 1.0 / math.sqrt(float(dim))

    wq, wk, wv = params["wq"], params["wk"], params["wv"]   # (H, C, D)
    ew, eb = params["ew"], params["eb"]                     # (H, N, K), (H, 1, K)
    fw, fb = params["fw"], params["fb"]                     # (H, N, K), (H, 1, K)
    wo, bo = params["wo"], params["bo"]                     # (H*D, C), (1, C)

    # ---- one-time weight prep, hoisted out of the kernel ----
    wq_s = wq * scale                                       # (H, C, D): 1/sqrt(dim) folded
    e_t = jnp.transpose(ew, (0, 2, 1)).reshape(H * K, N)    # rows h*K.. = E_h^T
    f_t = jnp.transpose(fw, (0, 2, 1)).reshape(H * K, N)    # rows h*K.. = F_h^T
    eft = jnp.concatenate([e_t, f_t], axis=0)               # (2*H*K, N): one fused projector
    eb_t = jnp.transpose(eb, (0, 2, 1))                     # (H, K, 1) column bias for Kp^T
    fb_t = jnp.transpose(fb, (0, 2, 1))                     # (H, K, 1) column bias for Vp^T

    if use_bf16:
        mdt = jnp.bfloat16
        x_in = x.astype(mdt)
        eft_m, wq_m, wk_m, wv_m, wo_m = (a.astype(mdt)
                                         for a in (eft, wq_s, wk, wv, wo))
    else:
        mdt = jnp.float32
        x_in, eft_m, wq_m, wk_m, wv_m, wo_m = x, eft, wq_s, wk, wv, wo
    # eb_t / fb_t / bo stay float32 (added after the f32-accumulated matmuls)

    x_flat = x_in.reshape(B * N, C)

    kernel = functools.partial(
        _linformer_mha_kernel, n_heads=H, dim=D, dim_k=K,
        activation=activation, compute_dtype=mdt, exact_softmax=exact_softmax)

    def resident(a):
        nd = a.ndim
        return pl.BlockSpec(a.shape, lambda b: (0,) * nd)   # grid-invariant weights

    # Explicit scoped-VMEM budget: resident weights (x2 in case the compiler double-buffers
    # invariant blocks) + double-buffered activation/output blocks + headroom for temporaries,
    # capped at v7x's 64 MiB physical VMEM per TensorCore.
    def nbytes(a):
        return int(a.size) * int(a.dtype.itemsize)
    resident_bytes = sum(nbytes(a) for a in
                         (eft_m, wq_m, wk_m, wv_m, eb_t, fb_t, wo_m, bo))
    block_bytes = N * C * (x_in.dtype.itemsize + jnp.dtype(out_dtype).itemsize)
    vmem_limit = 2 * resident_bytes + 2 * block_bytes + (8 << 20)
    vmem_limit = int(min(max(vmem_limit, 16 << 20), 64 << 20))

    out = pl.pallas_call(
        kernel,
        out_shape=jax.ShapeDtypeStruct((B * N, C), out_dtype),
        grid=(B,),                                           # one batch per pipelined step
        in_specs=[
            pl.BlockSpec((N, C), lambda b: (b, 0)),          # this batch's activation rows
            resident(eft_m),
            resident(wq_m), resident(wk_m), resident(wv_m),
            resident(eb_t), resident(fb_t),
            resident(wo_m), resident(bo),
        ],
        out_specs=pl.BlockSpec((N, C), lambda b: (b, 0)),
        compiler_params=pltpu.CompilerParams(
            dimension_semantics=("parallel",),               # batch steps shard across TCs (v7x)
            vmem_limit_bytes=vmem_limit),
    )(x_flat, eft_m, wq_m, wk_m, wv_m, eb_t, fb_t, wo_m, bo)

    return out.reshape(B, N, C)


def init_params(key, *, input_size, channels, dim, dim_k, n_heads):
    """Deterministic synthetic parameters (xavier-normal style)."""
    ks = jax.random.split(key, 9)

    def xavier(k, shape, fan_in, fan_out):
        std = math.sqrt(2.0 / (fan_in + fan_out))
        return (std * jax.random.normal(k, shape)).astype(jnp.float32)

    return dict(
        wq=xavier(ks[0], (n_heads, channels, dim), channels, dim),
        wk=xavier(ks[1], (n_heads, channels, dim), channels, dim),
        wv=xavier(ks[2], (n_heads, channels, dim), channels, dim),
        ew=xavier(ks[3], (n_heads, input_size, dim_k), input_size, dim_k),
        fw=xavier(ks[4], (n_heads, input_size, dim_k), input_size, dim_k),
        eb=(0.01 * jax.random.normal(ks[5], (n_heads, 1, dim_k))).astype(jnp.float32),
        fb=(0.01 * jax.random.normal(ks[6], (n_heads, 1, dim_k))).astype(jnp.float32),
        wo=xavier(ks[7], (n_heads * dim, channels), n_heads * dim, channels),
        bo=(0.01 * jax.random.normal(ks[8], (1, channels))).astype(jnp.float32),
    )


def reference(x, p, *, dim, n_heads, activation):
    """Pure-JAX replica of the PyTorch forward (for verification)."""
    outs = []
    for h in range(n_heads):
        Q = x @ p["wq"][h]                                           # (B, N, D)
        K = x @ p["wk"][h]
        V = x @ p["wv"][h]
        Kp = jnp.einsum("bnd,nk->bdk", K, p["ew"][h]) + p["eb"][h]   # (B, D, k)
        S = jnp.einsum("bnd,bdk->bnk", Q, Kp) / math.sqrt(float(dim))
        P = jax.nn.softmax(S, axis=-1)
        Vp = jnp.einsum("bnd,nk->bdk", V, p["fw"][h]) + p["fb"][h]   # (B, D, k)
        outs.append(jnp.einsum("bnk,bdk->bnd", P, Vp))               # (B, N, D)
    out = jnp.concatenate(outs, axis=-1)
    if activation == "relu":
        out = jax.nn.relu(out)
    elif activation == "gelu":
        out = jax.nn.gelu(out, approximate=False)
    return out @ p["wo"] + p["bo"]


if __name__ == "__main__":
    # Small config consistent with the module's constructor:
    # input_size (seq) = 16, channels = 32, per-head dim = 16, dim_k = 8, n_heads = 2
    B, N, C = 2, 16, 32
    DIM, DIM_K, HEADS = 16, 8, 2
    ACT = "relu"          # one of {'gelu', 'relu', None} as in get_act()

    key = jax.random.PRNGKey(0)
    kx, kp = jax.random.split(key)
    x = jax.random.normal(kx, (B, N, C), dtype=jnp.float32)
    params = init_params(kp, input_size=N, channels=C, dim=DIM, dim_k=DIM_K,
                         n_heads=HEADS)

    fwd = jax.jit(linformer_mha,
                  static_argnames=("dim", "dim_k", "n_heads", "activation",
                                   "use_bf16", "exact_softmax"))

    ref = jax.block_until_ready(
        reference(x, params, dim=DIM, n_heads=HEADS, activation=ACT))

    # 1) f32 MXU operands, exact softmax normalisation -- strict check.
    out_f32 = jax.block_until_ready(
        fwd(x, params, dim=DIM, dim_k=DIM_K, n_heads=HEADS, activation=ACT,
            use_bf16=False, exact_softmax=True))
    assert out_f32.shape == (B, N, C) and out_f32.dtype == jnp.float32
    assert jnp.allclose(out_f32, ref, rtol=1e-2, atol=1e-2), \
        float(jnp.max(jnp.abs(out_f32 - ref)))

    # 2) bf16 MXU operands (default fast path on v5e/v6e/v7x), f32 accumulate/softmax,
    #    approximate EUP reciprocal -- loose sanity check against the f32 reference.
    out_bf16 = jax.block_until_ready(
        fwd(x, params, dim=DIM, dim_k=DIM_K, n_heads=HEADS, activation=ACT,
            use_bf16=True, exact_softmax=False))
    assert out_bf16.shape == (B, N, C)
    assert jnp.allclose(out_bf16, ref, rtol=1e-1, atol=1e-1), \
        float(jnp.max(jnp.abs(out_bf16 - ref)))

    print("KERNEL_OK")
</pallas_src>

<mosaic_0001>
module attributes {stable_mosaic.version = 11 : i64} {
  func.func @_linformer_mha_kernel(%arg0: i32, %arg1: memref<16x32xf32, #tpu.memory_space<vmem>>, %arg2: memref<32x16xf32, #tpu.memory_space<vmem>>, %arg3: memref<2x32x16xf32, #tpu.memory_space<vmem>>, %arg4: memref<2x32x16xf32, #tpu.memory_space<vmem>>, %arg5: memref<2x32x16xf32, #tpu.memory_space<vmem>>, %arg6: memref<2x8x1xf32, #tpu.memory_space<vmem>>, %arg7: memref<2x8x1xf32, #tpu.memory_space<vmem>>, %arg8: memref<32x32xf32, #tpu.memory_space<vmem>>, %arg9: memref<1x32xf32, #tpu.memory_space<vmem>>, %arg10: memref<16x32xf32, #tpu.memory_space<vmem>>) attributes {dimension_semantics = [#tpu.dimension_semantics<parallel>], iteration_bounds = array<i64: 2>, scalar_prefetch = 0 : i64, scratch_operands = 0 : i64, tpu.core_type = #tpu.core_type<tc>, window_params = [{transform_indices = @transform_0, window_bounds = array<i64: 16, 32>}, {pipeline_mode = #tpu.pipeline_mode<synchronous>, transform_indices = @transform_1, window_bounds = array<i64: 32, 16>}, {pipeline_mode = #tpu.pipeline_mode<synchronous>, transform_indices = @transform_2, window_bounds = array<i64: 2, 32, 16>}, {pipeline_mode = #tpu.pipeline_mode<synchronous>, transform_indices = @transform_3, window_bounds = array<i64: 2, 32, 16>}, {pipeline_mode = #tpu.pipeline_mode<synchronous>, transform_indices = @transform_4, window_bounds = array<i64: 2, 32, 16>}, {pipeline_mode = #tpu.pipeline_mode<synchronous>, transform_indices = @transform_5, window_bounds = array<i64: 2, 8, 1>}, {pipeline_mode = #tpu.pipeline_mode<synchronous>, transform_indices = @transform_6, window_bounds = array<i64: 2, 8, 1>}, {pipeline_mode = #tpu.pipeline_mode<synchronous>, transform_indices = @transform_7, window_bounds = array<i64: 32, 32>}, {pipeline_mode = #tpu.pipeline_mode<synchronous>, transform_indices = @transform_8, window_bounds = array<i64: 1, 32>}, {transform_indices = @transform_9, window_bounds = array<i64: 16, 32>}]} {
    %c0 = arith.constant 0 : index
    %c0_0 = arith.constant 0 : index
    %0 = vector.load %arg1[%c0, %c0_0] : memref<16x32xf32, #tpu.memory_space<vmem>>, vector<16x32xf32>
    %c0_1 = arith.constant 0 : index
    %c0_2 = arith.constant 0 : index
    %1 = vector.load %arg2[%c0_1, %c0_2] : memref<32x16xf32, #tpu.memory_space<vmem>>, vector<32x16xf32>
    %cst = arith.constant dense<0.000000e+00> : vector<32x32xf32>
    %2 = tpu.matmul %1, %0, %cst {dimension_numbers = #tpu.dot_dimension_numbers<[1], [0], [0], [1], [0, 0, 1, 1], [], []>} : vector<32x16xf32>, vector<16x32xf32>, vector<32x32xf32> -> vector<32x32xf32>
    %3 = vector.extract_strided_slice %2 {offsets = [0, 0], sizes = [8, 32], strides = [1, 1]} : vector<32x32xf32> to vector<8x32xf32>
    %4 = vector.extract_strided_slice %2 {offsets = [16, 0], sizes = [8, 32], strides = [1, 1]} : vector<32x32xf32> to vector<8x32xf32>
    %c0_3 = arith.constant 0 : index
    %c0_4 = arith.constant 0 : index
    %c0_5 = arith.constant 0 : index
    %5 = vector.load %arg4[%c0_3, %c0_4, %c0_5] : memref<2x32x16xf32, #tpu.memory_space<vmem>>, vector<1x32x16xf32>
    %6 = vector.shape_cast %5 : vector<1x32x16xf32> to vector<32x16xf32>
    %cst_6 = arith.constant dense<0.000000e+00> : vector<8x16xf32>
    %7 = tpu.matmul %3, %6, %cst_6 {dimension_numbers = #tpu.dot_dimension_numbers<[1], [0], [0], [1], [0, 0, 1, 1], [], []>} : vector<8x32xf32>, vector<32x16xf32>, vector<8x16xf32> -> vector<8x16xf32>
    %c0_7 = arith.constant 0 : index
    %c0_8 = arith.constant 0 : index
    %c0_9 = arith.constant 0 : index
    %8 = vector.load %arg6[%c0_7, %c0_8, %c0_9] : memref<2x8x1xf32, #tpu.memory_space<vmem>>, vector<1x8x1xf32>
    %9 = vector.shape_cast %8 : vector<1x8x1xf32> to vector<8x1xf32>
    %10 = vector.broadcast %9 : vector<8x1xf32> to vector<8x16xf32>
    %11 = arith.addf %7, %10 : vector<8x16xf32>
    %c0_10 = arith.constant 0 : index
    %c0_11 = arith.constant 0 : index
    %c0_12 = arith.constant 0 : index
    %12 = vector.load %arg5[%c0_10, %c0_11, %c0_12] : memref<2x32x16xf32, #tpu.memory_space<vmem>>, vector<1x32x16xf32>
    %13 = vector.shape_cast %12 : vector<1x32x16xf32> to vector<32x16xf32>
    %cst_13 = arith.constant dense<0.000000e+00> : vector<8x16xf32>
    %14 = tpu.matmul %4, %13, %cst_13 {dimension_numbers = #tpu.dot_dimension_numbers<[1], [0], [0], [1], [0, 0, 1, 1], [], []>} : vector<8x32xf32>, vector<32x16xf32>, vector<8x16xf32> -> vector<8x16xf32>
    %c0_14 = arith.constant 0 : index
    %c0_15 = arith.constant 0 : index
    %c0_16 = arith.constant 0 : index
    %15 = vector.load %arg7[%c0_14, %c0_15, %c0_16] : memref<2x8x1xf32, #tpu.memory_space<vmem>>, vector<1x8x1xf32>
    %16 = vector.shape_cast %15 : vector<1x8x1xf32> to vector<8x1xf32>
    %17 = vector.broadcast %16 : vector<8x1xf32> to vector<8x16xf32>
    %18 = arith.addf %14, %17 : vector<8x16xf32>
    %c0_17 = arith.constant 0 : index
    %c0_18 = arith.constant 0 : index
    %c0_19 = arith.constant 0 : index
    %19 = vector.load %arg3[%c0_17, %c0_18, %c0_19] : memref<2x32x16xf32, #tpu.memory_space<vmem>>, vector<1x32x16xf32>
    %20 = vector.shape_cast %19 : vector<1x32x16xf32> to vector<32x16xf32>
    %cst_20 = arith.constant dense<0.000000e+00> : vector<16x16xf32>
    %21 = tpu.matmul %0, %20, %cst_20 {dimension_numbers = #tpu.dot_dimension_numbers<[1], [0], [0], [1], [0, 0, 1, 1], [], []>} : vector<16x32xf32>, vector<32x16xf32>, vector<16x16xf32> -> vector<16x16xf32>
    %cst_21 = arith.constant dense<0.000000e+00> : vector<16x8xf32>
    %22 = tpu.matmul %21, %11, %cst_21 {dimension_numbers = #tpu.dot_dimension_numbers<[1], [1], [0], [0], [0, 0, 1, 0], [], []>} : vector<16x16xf32>, vector<8x16xf32>, vector<16x8xf32> -> vector<16x8xf32>
    %cst_22 = arith.constant dense<0xFF800000> : vector<16xf32>
    %23 = vector.multi_reduction <maximumf>, %22, %cst_22 [1] : vector<16x8xf32> to vector<16xf32>
    %24 = vector.shape_cast %23 : vector<16xf32> to vector<16x1xf32>
    %25 = vector.broadcast %24 : vector<16x1xf32> to vector<16x8xf32>
    %26 = arith.subf %22, %25 : vector<16x8xf32>
    %27 = math.exp %26 : vector<16x8xf32>
    %cst_23 = arith.constant dense<0.000000e+00> : vector<16xf32>
    %28 = vector.multi_reduction <add>, %27, %cst_23 [1] : vector<16x8xf32> to vector<16xf32>
    %29 = vector.shape_cast %28 : vector<16xf32> to vector<16x1xf32>
    %30 = vector.broadcast %29 : vector<16x1xf32> to vector<16x8xf32>
    %31 = arith.divf %27, %30 : vector<16x8xf32>
    %cst_24 = arith.constant dense<0.000000e+00> : vector<16x16xf32>
    %32 = tpu.matmul %31, %18, %cst_24 {dimension_numbers = #tpu.dot_dimension_numbers<[1], [0], [0], [1], [0, 0, 1, 1], [], []>} : vector<16x8xf32>, vector<8x16xf32>, vector<16x16xf32> -> vector<16x16xf32>
    %33 = vector.extract_strided_slice %2 {offsets = [8, 0], sizes = [8, 32], strides = [1, 1]} : vector<32x32xf32> to vector<8x32xf32>
    %34 = vector.extract_strided_slice %2 {offsets = [24, 0], sizes = [8, 32], strides = [1, 1]} : vector<32x32xf32> to vector<8x32xf32>
    %c1 = arith.constant 1 : index
    %c0_25 = arith.constant 0 : index
    %c0_26 = arith.constant 0 : index
    %35 = vector.load %arg4[%c1, %c0_25, %c0_26] : memref<2x32x16xf32, #tpu.memory_space<vmem>>, vector<1x32x16xf32>
    %36 = vector.shape_cast %35 : vector<1x32x16xf32> to vector<32x16xf32>
    %cst_27 = arith.constant dense<0.000000e+00> : vector<8x16xf32>
    %37 = tpu.matmul %33, %36, %cst_27 {dimension_numbers = #tpu.dot_dimension_numbers<[1], [0], [0], [1], [0, 0, 1, 1], [], []>} : vector<8x32xf32>, vector<32x16xf32>, vector<8x16xf32> -> vector<8x16xf32>
    %c1_28 = arith.constant 1 : index
    %c0_29 = arith.constant 0 : index
    %c0_30 = arith.constant 0 : index
    %38 = vector.load %arg6[%c1_28, %c0_29, %c0_30] : memref<2x8x1xf32, #tpu.memory_space<vmem>>, vector<1x8x1xf32>
    %39 = vector.shape_cast %38 : vector<1x8x1xf32> to vector<8x1xf32>
    %40 = vector.broadcast %39 : vector<8x1xf32> to vector<8x16xf32>
    %41 = arith.addf %37, %40 : vector<8x16xf32>
    %c1_31 = arith.constant 1 : index
    %c0_32 = arith.constant 0 : index
    %c0_33 = arith.constant 0 : index
    %42 = vector.load %arg5[%c1_31, %c0_32, %c0_33] : memref<2x32x16xf32, #tpu.memory_space<vmem>>, vector<1x32x16xf32>
    %43 = vector.shape_cast %42 : vector<1x32x16xf32> to vector<32x16xf32>
    %cst_34 = arith.constant dense<0.000000e+00> : vector<8x16xf32>
    %44 = tpu.matmul %34, %43, %cst_34 {dimension_numbers = #tpu.dot_dimension_numbers<[1], [0], [0], [1], [0, 0, 1, 1], [], []>} : vector<8x32xf32>, vector<32x16xf32>, vector<8x16xf32> -> vector<8x16xf32>
    %c1_35 = arith.constant 1 : index
    %c0_36 = arith.constant 0 : index
    %c0_37 = arith.constant 0 : index
    %45 = vector.load %arg7[%c1_35, %c0_36, %c0_37] : memref<2x8x1xf32, #tpu.memory_space<vmem>>, vector<1x8x1xf32>
    %46 = vector.shape_cast %45 : vector<1x8x1xf32> to vector<8x1xf32>
    %47 = vector.broadcast %46 : vector<8x1xf32> to vector<8x16xf32>
    %48 = arith.addf %44, %47 : vector<8x16xf32>
    %c1_38 = arith.constant 1 : index
    %c0_39 = arith.constant 0 : index
    %c0_40 = arith.constant 0 : index
    %49 = vector.load %arg3[%c1_38, %c0_39, %c0_40] : memref<2x32x16xf32, #tpu.memory_space<vmem>>, vector<1x32x16xf32>
    %50 = vector.shape_cast %49 : vector<1x32x16xf32> to vector<32x16xf32>
    %cst_41 = arith.constant dense<0.000000e+00> : vector<16x16xf32>
    %51 = tpu.matmul %0, %50, %cst_41 {dimension_numbers = #tpu.dot_dimension_numbers<[1], [0], [0], [1], [0, 0, 1, 1], [], []>} : vector<16x32xf32>, vector<32x16xf32>, vector<16x16xf32> -> vector<16x16xf32>
    %cst_42 = arith.constant dense<0.000000e+00> : vector<16x8xf32>
    %52 = tpu.matmul %51, %41, %cst_42 {dimension_numbers = #tpu.dot_dimension_numbers<[1], [1], [0], [0], [0, 0, 1, 0], [], []>} : vector<16x16xf32>, vector<8x16xf32>, vector<16x8xf32> -> vector<16x8xf32>
    %cst_43 = arith.constant dense<0xFF800000> : vector<16xf32>
    %53 = vector.multi_reduction <maximumf>, %52, %cst_43 [1] : vector<16x8xf32> to vector<16xf32>
    %54 = vector.shape_cast %53 : vector<16xf32> to vector<16x1xf32>
    %55 = vector.broadcast %54 : vector<16x1xf32> to vector<16x8xf32>
    %56 = arith.subf %52, %55 : vector<16x8xf32>
    %57 = math.exp %56 : vector<16x8xf32>
    %cst_44 = arith.constant dense<0.000000e+00> : vector<16xf32>
    %58 = vector.multi_reduction <add>, %57, %cst_44 [1] : vector<16x8xf32> to vector<16xf32>
    %59 = vector.shape_cast %58 : vector<16xf32> to vector<16x1xf32>
    %60 = vector.broadcast %59 : vector<16x1xf32> to vector<16x8xf32>
    %61 = arith.divf %57, %60 : vector<16x8xf32>
    %cst_45 = arith.constant dense<0.000000e+00> : vector<16x16xf32>
    %62 = tpu.matmul %61, %48, %cst_45 {dimension_numbers = #tpu.dot_dimension_numbers<[1], [0], [0], [1], [0, 0, 1, 1], [], []>} : vector<16x8xf32>, vector<8x16xf32>, vector<16x16xf32> -> vector<16x16xf32>
    %63 = tpu.concatenate %32, %62 in 1 : vector<16x16xf32>, vector<16x16xf32> -> vector<16x32xf32>
    %cst_46 = arith.constant 0.000000e+00 : f32
    %64 = vector.broadcast %cst_46 : f32 to vector<16x32xf32>
    %65 = arith.maximumf %63, %64 : vector<16x32xf32>
    %c0_47 = arith.constant 0 : index
    %c0_48 = arith.constant 0 : index
    %66 = vector.load %arg8[%c0_47, %c0_48] : memref<32x32xf32, #tpu.memory_space<vmem>>, vector<32x32xf32>
    %cst_49 = arith.constant dense<0.000000e+00> : vector<16x32xf32>
    %67 = tpu.matmul %65, %66, %cst_49 {dimension_numbers = #tpu.dot_dimension_numbers<[1], [0], [0], [1], [0, 0, 1, 1], [], []>} : vector<16x32xf32>, vector<32x32xf32>, vector<16x32xf32> -> vector<16x32xf32>
    %c0_50 = arith.constant 0 : index
    %c0_51 = arith.constant 0 : index
    %68 = vector.load %arg9[%c0_50, %c0_51] : memref<1x32xf32, #tpu.memory_space<vmem>>, vector<1x32xf32>
    %69 = vector.broadcast %68 : vector<1x32xf32> to vector<16x32xf32>
    %70 = arith.addf %67, %69 : vector<16x32xf32>
    %c0_52 = arith.constant 0 : index
    %c0_53 = arith.constant 0 : index
    %71 = vector.load %arg10[%c0_52, %c0_53] : memref<16x32xf32, #tpu.memory_space<vmem>>, vector<16x32xf32>
    tpu.vector_store %arg10[%c0_52, %c0_53], %70 {strides = array<i32>} : memref<16x32xf32, #tpu.memory_space<vmem>>, vector<16x32xf32>,
    return
  }
  func.func @transform_0(%arg0: i32) -> (i32, i32) {
    %c0_i32 = arith.constant 0 : i32
    %c0_i32_0 = arith.constant 0 : i32
    return %arg0, %c0_i32 : i32, i32
  }
  func.func @transform_1(%arg0: i32) -> (i32, i32) {
    %c0_i32 = arith.constant 0 : i32
    %c0_i32_0 = arith.constant 0 : i32
    %c0_i32_1 = arith.constant 0 : i32
    return %c0_i32, %c0_i32_0 : i32, i32
  }
  func.func @transform_2(%arg0: i32) -> (i32, i32, i32) {
    %c0_i32 = arith.constant 0 : i32
    %c0_i32_0 = arith.constant 0 : i32
    %c0_i32_1 = arith.constant 0 : i32
    %c0_i32_2 = arith.constant 0 : i32
    return %c0_i32, %c0_i32_0, %c0_i32_1 : i32, i32, i32
  }
  func.func @transform_3(%arg0: i32) -> (i32, i32, i32) {
    %c0_i32 = arith.constant 0 : i32
    %c0_i32_0 = arith.constant 0 : i32
    %c0_i32_1 = arith.constant 0 : i32
    %c0_i32_2 = arith.constant 0 : i32
    return %c0_i32, %c0_i32_0, %c0_i32_1 : i32, i32, i32
  }
  func.func @transform_4(%arg0: i32) -> (i32, i32, i32) {
    %c0_i32 = arith.constant 0 : i32
    %c0_i32_0 = arith.constant 0 : i32
    %c0_i32_1 = arith.constant 0 : i32
    %c0_i32_2 = arith.constant 0 : i32
    return %c0_i32, %c0_i32_0, %c0_i32_1 : i32, i32, i32
  }
  func.func @transform_5(%arg0: i32) -> (i32, i32, i32) {
    %c0_i32 = arith.constant 0 : i32
    %c0_i32_0 = arith.constant 0 : i32
    %c0_i32_1 = arith.constant 0 : i32
    %c0_i32_2 = arith.constant 0 : i32
    return %c0_i32, %c0_i32_0, %c0_i32_1 : i32, i32, i32
  }
  func.func @transform_6(%arg0: i32) -> (i32, i32, i32) {
    %c0_i32 = arith.constant 0 : i32
    %c0_i32_0 = arith.constant 0 : i32
    %c0_i32_1 = arith.constant 0 : i32
    %c0_i32_2 = arith.constant 0 : i32
    return %c0_i32, %c0_i32_0, %c0_i32_1 : i32, i32, i32
  }
  func.func @transform_7(%arg0: i32) -> (i32, i32) {
    %c0_i32 = arith.constant 0 : i32
    %c0_i32_0 = arith.constant 0 : i32
    %c0_i32_1 = arith.constant 0 : i32
    return %c0_i32, %c0_i32_0 : i32, i32
  }
  func.func @transform_8(%arg0: i32) -> (i32, i32) {
    %c0_i32 = arith.constant 0 : i32
    %c0_i32_0 = arith.constant 0 : i32
    %c0_i32_1 = arith.constant 0 : i32
    return %c0_i32, %c0_i32_0 : i32, i32
  }
  func.func @transform_9(%arg0: i32) -> (i32, i32) {
    %c0_i32 = arith.constant 0 : i32
    %c0_i32_0 = arith.constant 0 : i32
    return %arg0, %c0_i32 : i32, i32
  }
}

</mosaic_0001>

<bundles_post_ra>
// kernel: linformer_mha.1
= control target key start
LH: loop header
LB: loop body
LE: loop exit
PB: predicated region body
PF: predicated region fallthrough
CT: control target
= control target key end

     0   :  { %14 = vsyncpa [#allocation3], 0  ;;  %s2228_s0 = inlined_call_operand.vmem [shape: f32[32,32], index: 0, kind: input, shape index: {}]   ;;  %s2229_s1 = inlined_call_operand.vmem [shape: f32[32,16], index: 1, kind: input, shape index: {}]   ;;  %s2230_s2 = inlined_call_operand.vmem [shape: f32[2,32,16], index: 2, kind: input, shape index: {}]   ;;  %s2231_s3 = inlined_call_operand.vmem [shape: f32[2,32,16], index: 3, kind: input, shape index: {}]   ;;  %s2232_s4 = inlined_call_operand.vmem [shape: f32[2,32,16], index: 4, kind: input, shape index: {}]   ;;  %s2233_s5 = inlined_call_operand.vmem [shape: f32[2,8,1], index: 5, kind: input, shape index: {}]   ;;  %s2234_s6 = inlined_call_operand.vmem [shape: f32[2,8,1], index: 6, kind: input, shape index: {}]   ;;  %s2235_s7 = inlined_call_operand.vmem [shape: f32[32,32], index: 7, kind: input, shape index: {}]   ;;  %s2236_s8 = inlined_call_operand.vmem [shape: f32[1,32], index: 8, kind: input, shape index: {}]   ;;  %s2237_s9 = inlined_call_operand.hbm [shape: f32[32,32], index: 9, kind: output, shape index: {}]  }
   0x1   :  { %16 = vsyncpa [#allocation3 + $0x1], 0  ;;  %s1950_s30 = smov 0   ;;  %s1952_s10 = smov 0  }
   0x2   :  { %s1954_s11 = smov 0   ;;  %s1956_s12 = smov 0  }
   0x3 LB: > { %s1971_s13 = sadd.s32 4294967295, %s1890_s12   ;;  %s1497_s14 = sadd.s32 4294967294, %s1890_s12   ;;  %s1890_s12 = sphi %s1956_s12, %s2243_s12   ;;  %s1886_s11 = sphi %s1954_s11, %s2242_s11   ;;  %s1882_s10 = sphi %s1952_s10, %s2241_s10   ;;  %s1878_s30 = sphi %s1950_s30, %s2240_s30  }
   0x4   : > { %s1975_s15 = sadd.s32 1, %s1890_s12   ;;  %s223_s16 = sadd.s32 1, %s1886_s11 }
   0x5   : > { %s220_s17 = ssub.s32 %s1890_s12, %s1975_s15  ;;  %p233_p0 = scmp.ne.s32.totalorder %s1886_s11, %s1882_s10 }
   0x6   : > { %p221_p1 = scmp.eq.s32.totalorder %s220_s17, 0  ;;  %p234_p2 = scmp.eq.s32.totalorder %s1971_s13, 1 }
   0x7   : > { %p239_p3 = scmp.ne.s32.totalorder %s1882_s10, %s1878_s30  ;;  %p240_p4 = scmp.eq.s32.totalorder %s1497_s14, 1 }
   0x8   : > { %s1986_s18 = scalar_select %p221_p1, %s1886_s11, %s223_s16  }
   0x9   : > { %p1988_p5 = por %p234_p2, %p233_p0  ;;  %p1992_p6 = por %p240_p4, %p239_p3 }
   0xa   : > { %p1500_p7 = scmp.ge.s32.totalorder %s1890_s12, 1  ;;  %p291_p8 = scmp.lt.s32.totalorder %s1890_s12, 3 }
   0xc   : > { %p292_p9 = pnand %p1500_p7, %p291_p8 }
   0xd   : > { %s1502_s21 = sshll.u32 (!%p292_p9), %s1971_s13, 1  ;;  %v336_v0 = vld [vmem:[%s2229_s1] sm:$0xff] (!%p292_p9)  ;;  %vm340_vm0 = vcmask (!%p292_p9), 130048   ;;  %v1892_v2 = vmov (!%p292_p9), 0.0|0.0   ;;  %v439_v3 = vld [vmem:[%s2231_s3 + $0x8] sm:$0xff] (!%p292_p9)  ;;  %v440_v4 = vld [vmem:[%s2231_s3 + $0x10] sm:$0xff] (!%p292_p9) }
   0xe   : > { %295 = sbr.rel (%p292_p9) target bundleno = 2107 (0x83b), region = 56  ;;  %v438_v1 = vld [vmem:[%s2231_s3] sm:$0xff] (!%p292_p9)  ;;  %p328_p10 = scmp.lt.s32.totalorder (!%p292_p9), %s1502_s21, 3  ;;  %1609 = vmatprep.mubr.msk.f32.mxu0 (!%p292_p9), %vm340_vm0, %v336_v0  ;;  %1716 = vmatprep.subr.bf16.mxu1 (!%p292_p9), %v1892_v2  ;;  %v441_v5 = vld [vmem:[%s2231_s3 + $0x18] sm:$0xff] (!%p292_p9)  ;;  %v337_v11 = vld [vmem:[%s2229_s1 + $0x8] sm:$0xff] (!%p292_p9)  ;;  %vm1893_vm1 = vmmov (!%p292_p9), 0  }
   0xf   : > { %v1717_v6 = vpack.c.bf16 (!%p292_p9), %v439_v3, %v438_v1  ;;  %v1720_v7 = vpack.c.bf16 (!%p292_p9), %v441_v5, %v440_v4  ;;  %v605_v12 = vld [vmem:[%s2230_s2] sm:$0xff] (!%p292_p9)  ;;  %v606_v13 = vld [vmem:[%s2230_s2 + $0x8] sm:$0xff] (!%p292_p9)  ;;  %v1894_v15 = vmov (!%p292_p9), 0.0   ;;  %v338_v16 = vld [vmem:[%s2229_s1 + $0x10] sm:$0xff] (!%p292_p9)  ;;  %v1895_v21 = vmov (!%p292_p9), 0   ;;  %s324_s27 = sand.u32 (!%p292_p9), 1, %s1882_s10  }
  0x10   : > { %v1728_v14 = vpack.c.bf16 (!%p292_p9), %v606_v13, %v605_v12  ;;  %1623 = vmatprep.mubr.msk.f32.mxu1 (!%p292_p9), %vm1893_vm1, %v1894_v15  ;;  %v339_v17 = vld [vmem:[%s2229_s1 + $0x18] sm:$0xff] (!%p292_p9)  ;;  %v442_v18 = vld [vmem:[%s2233_s5] sm:$0xff] (!%p292_p9)  ;;  %v523_v20 = vld [vmem:[%s2232_s4 + $0x8] sm:$0xff] (!%p292_p9)  ;;  %1810 = vset.pattern.permute.xlu0 (!%p292_p9), %v1895_v21  ;;  %vm448_vm2 = vcmask (!%p292_p9), 261120   ;;  %vm774_vm3 = vcmask (!%p292_p9), 64512   ;;  %s1501_s28 = sshll.u32 (!%p292_p9), %s324_s27, 4 }
  0x11   : > { %1718 = vmatpush3.bf16.msra.mxu1 (!%p292_p9), %v1717_v6  ;;  %v522_v19 = vld [vmem:[%s2232_s4] sm:$0xff] (!%p292_p9)  ;;  %v524_v23 = vld [vmem:[%s2232_s4 + $0x10] sm:$0xff] (!%p292_p9)  ;;  %v525_v24 = vld [vmem:[%s2232_s4 + $0x18] sm:$0xff] (!%p292_p9)  ;;  %1811 = vset.pattern.permute.xlu1 (!%p292_p9), %v1895_v21  ;;  %s326_s16 = scalar_lea.vmem (!%p292_p9), [#allocation2], %s1501_s28  ;;  %s1548_s22 = sshll.u32 (!%p292_p9), %s1971_s13, 8 }
  0x12   : > { %1719 = vmatprep.subr.bf16.mxu1 (!%p292_p9), %v1892_v2  ;;  %v1723_v22 = vpack.c.bf16 (!%p292_p9), %v523_v20, %v522_v19  ;;  %445 = vperm.xlu0 (!%p292_p9), %1810, %v442_v18   ;;  %v1726_v25 = vpack.c.bf16 (!%p292_p9), %v525_v24, %v524_v23  ;;  %v607_v26 = vld [vmem:[%s2230_s2 + $0x10] sm:$0xff] (!%p292_p9)  ;;  %v608_v27 = vld [vmem:[%s2230_s2 + $0x18] sm:$0xff] (!%p292_p9)  ;;  %v1517_v31 = vld [vmem:[%s2231_s3 + $0x20] sm:$0xff] (!%p292_p9)  ;;  %s2183_s25 = scalar_lea.hbm (!%p292_p9), %s2237_s9, %s1548_s22  ;;  %s2187_s26 = scalar_lea.sflag (!%p292_p9), [#allocation3], %s324_s27 }
  0x13   : > { %v1732_v29 = vpack.c.bf16 (!%p292_p9), %v608_v27, %v607_v26  ;;  %v1518_v32 = vld [vmem:[%s2231_s3 + $0x28] sm:$0xff] (!%p292_p9)  ;;  %v1519_v34 = vld [vmem:[%s2231_s3 + $0x30] sm:$0xff] (!%p292_p9)  ;;  %v1520_v35 = vld [vmem:[%s2231_s3 + $0x38] sm:$0xff] (!%p292_p9) }
  0x14   : > { %v1737_v33 = vpack.c.bf16 (!%p292_p9), %v1518_v32, %v1517_v31  ;;  %v1740_v36 = vpack.c.bf16 (!%p292_p9), %v1520_v35, %v1519_v34  ;;  %v1529_v49 = vld [vmem:[%s2230_s2 + $0x20] sm:$0xff] (!%p292_p9)  ;;  %v1530_v50 = vld [vmem:[%s2230_s2 + $0x28] sm:$0xff] (!%p292_p9)  ;;  %v1531_v51 = vld [vmem:[%s2230_s2 + $0x30] sm:$0xff] (!%p292_p9) }
  0x15   : > { %s2245_s21 = smov (!%p328_p10, %s1502_s21), 3  ;;  %1721 = vmatpush3.bf16.msra.mxu1 %v1720_v7  ;;  %v1748_v52 = vpack.c.bf16 %v1530_v50, %v1529_v49  ;;  %v1532_v53 = vld [vmem:[%s2230_s2 + $0x38] sm:$0xff]  ;;  %v526_v59 = vld [vmem:[%s2234_s6] sm:$0xff] }
  0x16   : > { %s1503_s17 = sshll.u32 %s2245_s21, 3  ;;  %1729 = vmatprep.subr.bf16.mxu1 %v1728_v14  ;;  %v1752_v54 = vpack.c.bf16 %v1532_v53, %v1531_v51  ;;  %v1526_v23 = vld [vmem:[%s2232_s4 + $0x38] sm:$0xff]  ;;  %v1328_v53 = vld [vmem:[%s2235_s7 + $0x8] sm:$0xff]  ;;  %s1896_s21 = smov 16  }
  0x17   : > { %s331_s24 = scalar_lea.vmem %s2228_s0, %s1503_s17  ;;  %s1435_s17 = sshll.u32 %s326_s16, 4  ;;  %s2178_s17 = int_to_ptr.vmem [resolvable:$true] %s1435_s17 }
  0x18   : > { %v334_v8 = vld [vmem:[%s331_s24] sm:$0xff]  ;;  %v2020_v9 = vld [vmem:[%s331_s24 + $0x8] sm:$0xff]  ;;  %s1828_s13 = scalar_lea.vmem %s2178_s17, 256 }
  0x19   : > { %v1712_v10 = vpack.c.bf16 %v2020_v9, %v334_v8  ;;  %p1829_p11 = scmp.ne.s32.totalorder %s2178_s17, %s1828_s13 }
  0x1b   : > { %1713 = vmatprep.subr.bf16.mxu0 %v1712_v10  ;;  %p1830_p12 = pnand %p1829_p11, %p1988_p5 }
  0x1c   : > { %1715 = vmatpush3.bf16.msra.mxu0 %v1712_v10 }
  0x1d   : > { %1722 = vmatprep.subr.bf16.mxu0 %v1892_v2  ;;  %p1831_p13 = pneg %p1830_p12 }
  0x1f   : > { %1610 = vmatmul.mubr.msk.f32.vlgmr.msra.gmra.mrb[0].mxu0 %vm340_vm0, %v337_v11 }
  0x20   : > { %1612 = vmatprep.mubr.msk.f32.mxu0 %vm340_vm0, %v338_v16  ;;  %1724 = vmatpush3.bf16.msra.mxu0 %v1723_v22  ;;  %v1524_v16 = vld [vmem:[%s2232_s4 + $0x28] sm:$0xff]  ;;  %v1525_v22 = vld [vmem:[%s2232_s4 + $0x30] sm:$0xff] }
  0x21   : > { %1725 = vmatprep.subr.bf16.mxu0 %v1892_v2 }
  0x23   : > { %1613 = vmatmul.mubr.msk.f32.gmra.mrb[2].mxu0 %vm340_vm0, %v339_v17 }
  0x24   : > { %1634 = vmatprep.mubr.msk.f32.mxu0 %vm1893_vm1, %v1894_v15  ;;  %1727 = vmatpush3.bf16.msra.mxu0 %v1726_v25  ;;  %v1746_v25 = vpack.c.bf16 %v1526_v23, %v1525_v22 }
  0x91   : > { %v446_v39 = vpop.permute.xlu0 %445 }
  0xf2   : > { %v1611_v28 = vpop.f32.mrb[0].mxu0 }
  0xf3   : > { %v419_v30 = vpop.f32.mrb[1].mxu0 }
  0xf4   : > { %1624 = vmatmul.mubr.msk.f32.vlgmr.msra.gmra.mrb[0].mxu1 %vm448_vm2, %v419_v30 }
  0xf5   : > { %1731 = vmatpush3.bf16.msra.mxu1 %v1728_v14  ;;  %1645 = vmatprep.mubr.msk.f32.mxu1 %vm448_vm2, %v334_v8  ;;  %v1523_v14 = vld [vmem:[%s2232_s4 + $0x20] sm:$0xff] }
  0xf6   : > { %1733 = vmatprep.subr.bf16.mxu1 %v1732_v29  ;;  %v2090_v37 = vpop.f32.mrb[2].mxu0  ;;  %v1743_v20 = vpack.c.bf16 %v1524_v16, %v1523_v14 }
  0xf7   : > { %v429_v38 = vpop.f32.mrb[3].mxu0 }
  0xf8   : > { %1635 = vmatmul.mubr.msk.f32.vlgmr.msra.gmra.mrb[4].mxu0 %vm448_vm2, %v429_v38 }
  0xf9   : > { %1735 = vmatpush3.bf16.msra.mxu1 %v1732_v29 }
  0xfa   : > { %1736 = vmatprep.subr.bf16.mxu1 %v1892_v2 }
  0xfc   : > { %1646 = vmatmul.mubr.msk.f32.vlgmr.msra.gmra.mrb[2].mxu1 %vm448_vm2, %v2020_v9 }
  0xfd   : > { %1738 = vmatpush3.bf16.msra.mxu1 %v1737_v33  ;;  %1666 = vmatprep.mubr.msk.f32.mxu1 %vm1893_vm1, %v1894_v15 }
  0xfe   : > { %1739 = vmatprep.subr.bf16.mxu1 %v1892_v2 }
 0x101   : > { %1741 = vmatpush3.bf16.msra.mxu1 %v1740_v36 }
 0x102   : > { %1749 = vmatprep.subr.bf16.mxu1 %v1748_v52 }
 0x104   : > { %1667 = vmatmul.mubr.msk.f32.vlgmr.msra.gmra.mrb[4].mxu1 %vm448_vm2, %v1611_v28 }
 0x105   : > { %1688 = vmatprep.mubr.msk.f32.mxu1 %vm448_vm2, %v334_v8  ;;  %1751 = vmatpush3.bf16.msra.mxu1 %v1748_v52  ;;  %v1327_v52 = vld [vmem:[%s2235_s7] sm:$0xff] }
 0x106   : > { %1753 = vmatprep.subr.bf16.mxu1 %v1752_v54 }
 0x109   : > { %1755 = vmatpush3.bf16.msra.mxu1 %v1752_v54  ;;  %v1756_v54 = vpack.c.bf16 %v1328_v53, %v1327_v52 }
 0x10b   : > { %1757 = vmatprep.subr.bf16.mxu1 %v1756_v54 }
 0x10c   : > { %1689 = vmatmul.mubr.msk.f32.vlgmr.msra.gmra.mrb[6].mxu1 %vm448_vm2, %v2020_v9  ;;  %v1521_v9 = vld [vmem:[%s2233_s5 + $0x8] sm:$0xff] }
 0x10d   : > { %1759 = vmatpush3.bf16.msra.mxu1 %v1756_v54 }
 0x1c7   : > { %v518_v40 = vpop.f32.mrb[0].mxu1 }
 0x1c8   : > { %v519_v41 = vadd.f32 %v518_v40, %v446_v39  ;;  %v1625_v42 = vpop.f32.mrb[1].mxu1 }
 0x1ca   : > { %1648 = vmatprep.subr.msk.mxu0 %vm340_vm0, %v519_v41 }
 0x1cb   : > { %1649 = vmatpush3.xpose.msk.msra.mxu0 %vm340_vm0, %v519_v41  ;;  %v601_v47 = vpop.f32.mrb[4].mxu0 }
 0x1cc   : > { %v1636_v48 = vpop.f32.mrb[5].mxu0 }
 0x1cf   : > { %v1647_v43 = vpop.f32.mrb[2].mxu1 }
 0x1d0   : > { %v681_v44 = vpop.f32.mrb[3].mxu1 }
 0x1d1   : > { %1650 = vmatprep.mubr.msk.f32.mxu0 %vm340_vm0, %v681_v44 }
 0x1d2   : > { %1651 = vmatmul.mubr.msk.f32.vlgmr.msra.gmra.mrb[6].mxu0 %vm340_vm0, %v1647_v43  ;;  %v1527_v43 = vld [vmem:[%s2234_s6 + $0x8] sm:$0xff] }
 0x1d7   : > { %v2097_v45 = vpop.f32.mrb[4].mxu1 }
 0x1d8   : > { %v1668_v46 = vpop.f32.mrb[5].mxu1 }
 0x1df   : > { %v1690_v10 = vpop.f32.mrb[6].mxu1 }
 0x1e0   : > { %v1119_v11 = vpop.f32.mrb[7].mxu1 }
 0x2a5   : > { %v1652_v55 = vpop.f32.mrb[6].mxu0 }
 0x2a6   : > { %v765_v56 = vpop.f32.mrb[7].mxu0  ;;  %v778_v57 = vsel %vm774_vm3, %v1652_v55, -inf }
 0x2a7   : > { %779 = vmax.xlane.f32.xlu1 %v778_v57  ;;  %v775_v58 = vsel %vm774_vm3, %v765_v56, -inf }
 0x2a8   : > { %776 = vmax.xlane.f32.xlu0 %v775_v58 }
 0x2b8   : > { %529 = vperm.xlu1 %1811, %v526_v59  }
 0x334   : > { %v780_v60 = vpop.xlane.xlu1 %779 }
 0x335   : > { %v782_v61 = vsub.f32 %v1652_v55, %v780_v60  ;;  %v777_v62 = vpop.xlane.xlu0 %776  ;;  %v1329_v55 = vld [vmem:[%s2235_s7 + $0x10] sm:$0xff] }
 0x336   : > { %v781_v63 = vsub.f32 %v765_v56, %v777_v62  ;;  %v1330_v56 = vld [vmem:[%s2235_s7 + $0x18] sm:$0xff] }
 0x337   : > { %v785_v0 = vmul.f32 1.442695, %v782_v61  ;;  %v1760_v57 = vpack.c.bf16 %v1330_v56, %v1329_v55 }
 0x338   : > { %v783_v1 = vmul.f32 1.442695, %v781_v63  ;;  %v530_v3 = vpop.permute.xlu1 %529 }
 0x339   : > { %1812 = vpow2.f32 %v785_v0  ;;  %v602_v4 = vadd.f32 %v601_v47, %v530_v3  ;;  %1761 = vmatprep.subr.bf16.mxu1 %v1760_v57  ;;  %v1540_v3 = vld [vmem:[%s2236_s8] ss:$0 sm:$0xff] }
 0x33a   : > { %1814 = vpow2.f32 %v783_v1  ;;  %1763 = vmatpush3.bf16.msra.mxu1 %v1760_v57 }
 0x33b   : > { %1653 = vmatprep.subr.mxu0 %v602_v4 }
 0x33c   : > { %1654 = vmatpush3.msra.mxu0 %v602_v4 }
 0x33d   : > { %1742 = vmatprep.subr.bf16.mxu0 %v1892_v2 }
 0x343   : > { %v1813_v5 = vpop.eup %1812 }
 0x344   : > { %v790_v6 = vsel %vm774_vm3, %v1813_v5, 0.0  ;;  %v1815_v7 = vpop.eup %1814 }
 0x345   : > { %791 = vadd.xlane.f32.xlu1 %v790_v6  ;;  %v787_v8 = vsel %vm774_vm3, %v1815_v7, 0.0 }
 0x349   : > { %788 = vadd.xlane.f32.xlu1 %v787_v8 }
 0x35a   : > { %887 = vperm.xlu1 %1811, %v1521_v9  }
 0x3d2   : > { %v792_v12 = vpop.xlane.xlu1 %791 }
 0x3d3   : > { %1816 = vrcp.f32 %v792_v12 }
 0x3d6   : > { %v789_v13 = vpop.xlane.xlu1 %788 }
 0x3d7   : > { %1818 = vrcp.f32 %v789_v13 }
 0x3da   : > { %v888_v24 = vpop.permute.xlu1 %887 }
 0x3db   : > { %v960_v26 = vadd.f32 %v2097_v45, %v888_v24 }
 0x3dd   : > { %v1817_v17 = vpop.eup %1816 }
 0x3de   : > { %v796_v21 = vmul.f32 %v1817_v17, %v1813_v5 }
 0x3e1   : > { %v1819_v18 = vpop.eup %1818 }
 0x3e2   : > { %v794_v19 = vmul.f32 %v1819_v18, %v1815_v7 }
 0x3e4   : > { %1655 = vmatprep.mubr.msk.f32.mxu0 %vm774_vm3, %v794_v19 }
 0x3e5   : > { %1656 = vmatmul.mubr.msk.f32.vlgmr.msra.gmra.mrb[8].mxu0 %vm774_vm3, %v796_v21 }
 0x3e6   : > { %1744 = vmatpush3.bf16.msra.mxu0 %v1743_v20  ;;  %1677 = vmatprep.mubr.msk.f32.mxu0 %vm1893_vm1, %v1894_v15 }
 0x3e7   : > { %1745 = vmatprep.subr.bf16.mxu0 %v1892_v2 }
 0x3ea   : > { %1747 = vmatpush3.bf16.msra.mxu0 %v1746_v25 }
 0x3eb   : > { %1691 = vmatprep.subr.msk.mxu0 %vm340_vm0, %v960_v26 }
 0x3ed   : > { %1678 = vmatmul.mubr.msk.f32.vlgmr.msra.gmra.mrb[10].mxu0 %vm448_vm2, %v2090_v37 }
 0x3ee   : > { %1693 = vmatprep.mubr.msk.f32.mxu0 %vm340_vm0, %v1119_v11 }
 0x3f3   : > { %1692 = vmatpush3.xpose.msk.msra.mxu0 %vm340_vm0, %v960_v26 }
 0x3f6   : > { %1694 = vmatmul.mubr.msk.f32.vlgmr.msra.gmra.mrb[12].mxu0 %vm340_vm0, %v1690_v10 }
 0x4b8   : > { %v1657_v27 = vpop.f32.mrb[8].mxu0 }
 0x4b9   : > { %v869_v28 = vpop.f32.mrb[9].mxu0 }
 0x4c0   : > { %v1044_v29 = vpop.f32.mrb[10].mxu0 }
 0x4c1   : > { %v1679_v15 = vpop.f32.mrb[11].mxu0 }
 0x4c9   : > { %v1695_v30 = vpop.f32.mrb[12].mxu0 }
 0x4ca   : > { %v1203_v2 = vpop.f32.mrb[13].mxu0  ;;  %v1215_v31 = vsel %vm774_vm3, %v1695_v30, -inf }
 0x4cb   : > { %1216 = vmax.xlane.f32.xlu0 %v1215_v31  ;;  %v1212_v32 = vsel %vm774_vm3, %v1203_v2, -inf }
 0x4cc   : > { %1213 = vmax.xlane.f32.xlu1 %v1212_v32 }
 0x558   : > { %v1217_v33 = vpop.xlane.xlu0 %1216 }
 0x559   : > { %v1219_v34 = vsub.f32 %v1695_v30, %v1217_v33  ;;  %v1214_v35 = vpop.xlane.xlu1 %1213 }
 0x55a   : > { %v1218_v36 = vsub.f32 %v1203_v2, %v1214_v35 }
 0x55b   : > { %v1222_v37 = vmul.f32 1.442695, %v1219_v34 }
 0x55c   : > { %v1220_v38 = vmul.f32 1.442695, %v1218_v36 }
 0x55d   : > { %1820 = vpow2.f32 %v1222_v37 }
 0x55e   : > { %1822 = vpow2.f32 %v1220_v38 }
 0x567   : > { %v1821_v39 = vpop.eup %1820 }
 0x568   : > { %v1227_v40 = vsel %vm774_vm3, %v1821_v39, 0.0  ;;  %v1823_v41 = vpop.eup %1822 }
 0x569   : > { %1228 = vadd.xlane.f32.xlu0 %v1227_v40  ;;  %v1224_v42 = vsel %vm774_vm3, %v1823_v41, 0.0 }
 0x56d   : > { %1225 = vadd.xlane.f32.xlu0 %v1224_v42 }
 0x583   : > { %972 = vperm.xlu0 %1810, %v1527_v43  }
 0x5f6   : > { %v1229_v44 = vpop.xlane.xlu0 %1228 }
 0x5f7   : > { %1824 = vrcp.f32 %v1229_v44 }
 0x5fa   : > { %v1226_v45 = vpop.xlane.xlu0 %1225 }
 0x5fb   : > { %1826 = vrcp.f32 %v1226_v45 }
 0x601   : > { %v1825_v48 = vpop.eup %1824 }
 0x602   : > { %v973_v46 = vpop.permute.xlu0 %972  ;;  %v1233_v51 = vmul.f32 %v1825_v48, %v1821_v39 }
 0x603   : > { %v1045_v47 = vadd.f32 %v1044_v29, %v973_v46 }
 0x605   : > { %v1827_v49 = vpop.eup %1826  ;;  %1696 = vmatprep.subr.mxu0 %v1045_v47 }
 0x606   : > { %1697 = vmatpush3.msra.mxu0 %v1045_v47  ;;  %v1231_v50 = vmul.f32 %v1827_v49, %v1823_v41 }
 0x608   : > { %1698 = vmatprep.mubr.msk.f32.mxu0 %vm774_vm3, %v1231_v50 }
 0x609   : > { %1699 = vmatmul.mubr.msk.f32.vlgmr.msra.gmra.mrb[14].mxu0 %vm774_vm3, %v1233_v51 }
 0x6dc   : > { %v1700_v58 = vpop.f32.mrb[14].mxu0 }
 0x6dd   : > { %1319 = vrot.lane.b32.xlu1 %v1700_v58, %s1896_s21  ;;  %v1306_v59 = vpop.f32.mrb[15].mxu0 }
 0x6de   : > { %1317 = vrot.lane.b32.xlu0 %v1306_v59, %s1896_s21  ;;  %s1897_s21 = smov [#allocation2]  }
 0x6df   : > { %s1832_s28 = sshll.u32 %s1897_s21, 4  ;;  %s1833_s28 = int_to_ptr.vmem [resolvable:$false] %s1832_s28 }
 0x6e0   : > { %s1834_s29 = scalar_lea.vmem %s1833_s28, 512  ;;  %p1835_p0 = scmp.lt.s32.totalorder %s2178_s17, %s1833_s28 }
 0x6e1   : > { %p1836_p1 = scmp.lt.s32.totalorder %s1834_s29, %s1828_s13 }
 0x6e3   : > { %p1837_p2 = por %p1836_p1, %p1835_p0 }
 0x6e5   : > { %p1838_p3 = pnand %p1837_p2, %p1831_p13 }
 0x74f   : > { %v1320_v60 = vpop.permute.xlu1 %1319 }
 0x750   : > { %v1324_v61 = vsel %vm340_vm0, %v1657_v27, %v1320_v60  ;;  %v1318_v62 = vpop.permute.xlu0 %1317 }
 0x751   : > { %v1323_v63 = vsel %vm340_vm0, %v869_v28, %v1318_v62  ;;  %v1326_v1 = vmax.f32 %v1324_v61, 0.0 }
 0x752   : > { %v1325_v0 = vmax.f32 %v1323_v63, 0.0 }
 0x754   : > { %1709 = vmatprep.mubr.msk.f32.mxu1 %vm448_vm2, %v1325_v0 }
 0x755   : > { %1710 = vmatmul.mubr.msk.f32.vlgmr.msra.gmra.mrb[8].mxu1 %vm448_vm2, %v1326_v1 }
 0x828   : > { %v1711_v4 = vpop.f32.mrb[8].mxu1 }
 0x829   : > { %v1416_v5 = vadd.f32 %v1711_v4, %v1540_v3  ;;  %v1410_v6 = vpop.f32.mrb[9].mxu1 }
 0x82a   : > { %v1411_v7 = vadd.f32 %v1540_v3, %v1410_v6 }
 0x82b   : > { %1420 = vst.msk [vmem:[%s326_s16 + $0x8] sm:$0xff] %vm448_vm2, %v1416_v5 }
 0x82c   : > { %1419 = vst.msk [vmem:[%s326_s16] sm:$0xff] %vm448_vm2, %v1411_v7 }
 0x82d   : > { %1841 = shalt.err (!%p1838_p3)
}
 0x82e   : > { %s1842_s27 = scalar_lea.hbm %s2183_s25, 256  ;;  %s1846_s22 = scalar_lea.hbm %s2237_s9, 512 }
 0x82f   : > { %p1843_p4 = scmp.ne.s32.totalorder %s2183_s25, %s1842_s27  ;;  %p1847_p9 = scmp.lt.u32.totalorder %s2183_s25, %s2237_s9 }
 0x830   : > { %p1848_p10 = scmp.lt.u32.totalorder %s1846_s22, %s1842_s27  ;;  %p1850_p12 = scmp.lt.u32.totalorder %s1842_s27, %s2183_s25 }
 0x831   : > { %p1844_p7 = pnand %p1843_p4, %p1988_p5 }
 0x832   : > { %p1849_p11 = por %p1848_p10, %p1847_p9 }
 0x833   : > { %p1845_p8 = pneg %p1844_p7 }
 0x834   : > { %p1851_p13 = por %p1850_p12, %p1849_p11 }
 0x836   : > { %p1852_p0 = pnand %p1851_p13, %p1845_p8 }
 0x838   : > { %1855 = shalt.err (!%p1852_p0)
}
 0x839   : > { %s1898_s13 = smov 128   ;;  %s1899_s21 = smov 8  }
 0x83a   : > { %1764 = dma.vmem_to_hbm [thread:$0]  (%p1988_p5), %s2178_s17, 256, %s2183_s25, %s2187_s26, %s1898_s13, %s1898_s13, %s1899_s21  }
 0x83b PF: > { %p1770_p1 = scmp.ge.s32.totalorder %s1890_s12, 2  ;;  %s1450_s28 = sand.u32 1, %s1878_s30  }
 0x83c   : > { %s1451_s29 = scalar_lea.sflag [#allocation3], %s1450_s28 }
 0x83d   : > { %p1767_p2 = pnand %p1770_p1, %p1992_p6 }
 0x83f   : > { %1873 = dma.done.wait (!%p1767_p2), %s1451_s29, 256  }
 0x840   : > { %1875 = vsyncadd (!%p1767_p2), %s1451_s29, 4294967040  ;;  %p19_p3 = scmp.ge.s32.totalorder %s1975_s15, 4   ;;  %s2240_s30 = smov %s1882_s10 }
 0x841   : > { %s2241_s10 = smov %s1886_s11  ;;  %s2242_s11 = smov %s1986_s18 }
 0x842   : > { %s2243_s12 = smov %s1975_s15  ;;  %21 = sbr.rel (!%p19_p3) target bundleno = 3 (0x3), region = 96 }
 0x849   :  { %1456 = vsyncpa [#allocation3], 1 }
 0x84a   :  { %1458 = vsyncpa [#allocation3 + $0x1], 1 }

</bundles_post_ra>
